<compile_context>
chip_gen: v6e
topology: v6e:2x2x1
jax: 0.10.0
libtpu: 0.0.40
codegen_flags: <defaults>
</compile_context>

<pallas_src>
import functools

import jax
import jax.numpy as jnp
from jax.experimental import pallas as pl
from jax.experimental.pallas import tpu as pltpu

GEM_EPS = 1e-6       # clamp(min=eps) in the standard gem() implementation
BN_EPS = 1e-5        # nn.BatchNorm1d default eps
ARC_SCALE = 30.0     # scale of the (margin-free) cosine head
LANE = 128


def _round_up(n, m):
    return ((n + m - 1) // m) * m


def _pick_tile(n, candidates):
    for c in candidates:
        if n % c == 0:
            return c
    return n


def _vmem_limit_bytes():
    """Per-generation VMEM budget: v5e/v6e have 128 MiB/TC (allow 96 MiB),
    v7x only 64 MiB/TC (stay conservative at 44 MiB).  Falls back to the
    conservative limit if the hardware query is unavailable."""
    try:
        cap = pltpu.get_tpu_info().vmem_capacity_bytes
    except Exception:
        cap = 0
    if cap >= 100 * 1024 * 1024:
        return 96 * 1024 * 1024
    return 44 * 1024 * 1024


# --------------------------------------------------------------------------
# Kernel 1: GeM pooling + fc (pre-BN), grid = (batch tiles, channel tiles)
# --------------------------------------------------------------------------
def gem_fc_kernel(x_ref, fcw_t_ref, fcb_ref, h_ref, acc_ref, *, p, inv_hw):
    c = pl.program_id(1)

    @pl.when(c == 0)
    def _init():
        acc_ref[...] = jnp.zeros_like(acc_ref)

    # Native-dtype (typically bf16) load, f32 math.
    x = x_ref[...].astype(jnp.float32)                    # (tB, tC, HW)
    xc = jnp.maximum(x, GEM_EPS)                          # clamp(min=eps)

    # Integer-exponent fast path: repeated VPU multiplies instead of EUP pow
    # for the full (tB, tC, HW) tensor.
    p_int = int(round(p))
    if abs(p - p_int) < 1e-12 and 1 <= p_int <= 8:
        xp = xc
        for _ in range(p_int - 1):
            xp = xp * xc
    else:
        xp = jnp.power(xc, p)

    # GeM mean: HW axis is unpadded, so the plain sum * (1/HW) is exact.
    pooled = jnp.sum(xp, axis=-1) * inv_hw                # (tB, tC)
    pooled = jnp.power(pooled, 1.0 / p)                   # only tB*tC elems on EUP

    # Partial fc in f32 (matches the PyTorch reference numerics; K = tC is
    # small so the MXU f32 passes are negligible vs. the x stream).
    acc_ref[...] += jnp.dot(pooled, fcw_t_ref[...],
                            preferred_element_type=jnp.float32)

    @pl.when(c == pl.num_programs(1) - 1)
    def _finalize():
        h_ref[...] = acc_ref[...] + fcb_ref[...]          # pre-BN (tB, fc_dim_pad)


# --------------------------------------------------------------------------
# Kernel 2: BatchNorm1d (training-mode batch stats) + L2 norm, whole batch
# --------------------------------------------------------------------------
def bn_norm_kernel(h_ref, feat_ref, fn_ref):
    # TODO(synk): eval-mode BatchNorm (running stats) and running-stat updates
    # are not implemented; training-mode batch statistics with gamma=1, beta=0.
    h = h_ref[...]                                        # (B, fc_dim_pad) f32
    mu = jnp.mean(h, axis=0, keepdims=True)
    d = h - mu
    var = jnp.mean(d * d, axis=0, keepdims=True)          # biased variance
    feat = d * jax.lax.rsqrt(var + BN_EPS)
    feat_ref[...] = feat
    # L2-normalized feature for the cosine head (padded fc lanes are exactly 0).
    fn = feat * jax.lax.rsqrt(jnp.sum(feat * feat, axis=-1, keepdims=True) + 1e-12)
    fn_ref[...] = fn.astype(fn_ref.dtype)


# --------------------------------------------------------------------------
# Kernel 3: scaled-cosine head (norm + scale pre-folded into the weights)
# --------------------------------------------------------------------------
def arc_kernel(fn_ref, arc_t_ref, logits_ref):
    # TODO(synk): self.loss_module is never defined in the reference __init__;
    # a margin-free scaled-cosine head (ArcMargin inference path) is used here
    # and `label` is ignored.
    logits_ref[...] = jnp.dot(fn_ref[...], arc_t_ref[...],
                              preferred_element_type=jnp.float32)


# --------------------------------------------------------------------------
# One-time weight preparation (hoisted out of the per-step forward)
# --------------------------------------------------------------------------
def prepare_params(fc_w, fc_b, arc_w, *, scale=ARC_SCALE):
    fc_dim, _ = fc_w.shape
    n_cls = arc_w.shape[0]
    fc_dim_pad = _round_up(fc_dim, LANE)

    # Large class tiles: pad n_cls to a multiple of the tile (up to 1024) so
    # the cosine-head grid has few, lane-dense steps even at n_cls ~ 11k.
    n_cls_128 = _round_up(n_cls, LANE)
    tN = min(1024, n_cls_128)
    n_cls_pad = _round_up(n_cls, tN)

    # fc weight pre-transposed to (C, fc_dim_pad), kept f32 (reference numerics).
    fcw_t = jnp.pad(fc_w.astype(jnp.float32).T,
                    ((0, 0), (0, fc_dim_pad - fc_dim)))
    fcb = jnp.pad(fc_b.astype(jnp.float32),
                  (0, fc_dim_pad - fc_dim)).reshape(1, fc_dim_pad)

    # Fold the per-class L2 row normalization AND the cosine scale into the
    # arc weight itself (in f32, before the bf16 cast): the arc kernel becomes
    # a bare matmul with no epilogue and no (1, tN) side-input stream.
    arc_f32 = arc_w.astype(jnp.float32)
    inv_wn = jax.lax.rsqrt(jnp.sum(arc_f32 * arc_f32, axis=1, keepdims=True) + 1e-12)
    arc_scaled = (scale * inv_wn) * arc_f32
    arc_t = jnp.pad(arc_scaled.T, ((0, fc_dim_pad - fc_dim),
                                   (0, n_cls_pad - n_cls))).astype(jnp.bfloat16)

    return dict(fcw_t=fcw_t, fcb=fcb, arc_t=arc_t,
                fc_dim=fc_dim, n_cls=n_cls, tN=tN)


# --------------------------------------------------------------------------
# Forward pass
# --------------------------------------------------------------------------
def shopee_forward(x_nchw, label, params, p=3.0):
    """x_nchw: backbone feature map (B, C, H, W) in its native dtype.
    Returns (logits, feat)."""
    del label  # only consumed by the (margin-free) cosine head
    B, C, H, W = x_nchw.shape
    fcw_t, fcb, arc_t = params["fcw_t"], params["fcb"], params["arc_t"]
    fc_dim, n_cls, tN = params["fc_dim"], params["n_cls"], params["tN"]
    fc_dim_pad = fcw_t.shape[1]
    n_cls_pad = arc_t.shape[1]
    HW = H * W
    vmem_limit = _vmem_limit_bytes()

    # x stays in its native dtype and its HW axis stays UNPADDED: the block's
    # last dim equals the full array dim, so no wrapper pad / cast pass.
    x = x_nchw.reshape(B, C, HW)

    tC = _pick_tile(C, (512, 256, 128, 64, 32, 16, 8))   # channel (reduction) tile
    # Two batch tiles when B allows (parallel axis -> both v7x TensorCores);
    # degenerates to a single tile (grid extent 1) otherwise.
    tB = B // 2 if (B % 16 == 0) else B
    nb = B // tB

    # ---- kernel 1: GeM + fc (pre-BN), batch-parallel x channel-reduction ----
    k1 = functools.partial(gem_fc_kernel, p=float(p), inv_hw=1.0 / float(HW))
    h_pad = pl.pallas_call(
        k1,
        grid=(nb, C // tC),
        in_specs=[
            pl.BlockSpec((tB, tC, HW), lambda b, c: (b, c, 0)),
            pl.BlockSpec((tC, fc_dim_pad), lambda b, c: (c, 0)),
            pl.BlockSpec((1, fc_dim_pad), lambda b, c: (0, 0)),
        ],
        out_specs=pl.BlockSpec((tB, fc_dim_pad), lambda b, c: (b, 0)),
        out_shape=jax.ShapeDtypeStruct((B, fc_dim_pad), jnp.float32),
        scratch_shapes=[pltpu.VMEM((tB, fc_dim_pad), jnp.float32)],
        compiler_params=pltpu.CompilerParams(
            dimension_semantics=("parallel", "arbitrary"),
            vmem_limit_bytes=vmem_limit),
    )(x, fcw_t, fcb)

    # ---- kernel 2: BN + L2 norm over the full batch (tiny) ----
    feat_pad, fn_pad = pl.pallas_call(
        bn_norm_kernel,
        grid=(1,),
        in_specs=[pl.BlockSpec((B, fc_dim_pad), lambda i: (0, 0))],
        out_specs=(pl.BlockSpec((B, fc_dim_pad), lambda i: (0, 0)),
                   pl.BlockSpec((B, fc_dim_pad), lambda i: (0, 0))),
        out_shape=(jax.ShapeDtypeStruct((B, fc_dim_pad), jnp.float32),   # feat
                   jax.ShapeDtypeStruct((B, fc_dim_pad), jnp.bfloat16)),  # L2-normed
        compiler_params=pltpu.CompilerParams(vmem_limit_bytes=vmem_limit),
    )(h_pad)

    # ---- kernel 3: scaled-cosine head over large class tiles ----
    logits_pad = pl.pallas_call(
        arc_kernel,
        grid=(n_cls_pad // tN,),
        in_specs=[
            pl.BlockSpec((B, fc_dim_pad), lambda j: (0, 0)),
            pl.BlockSpec((fc_dim_pad, tN), lambda j: (0, j)),
        ],
        out_specs=pl.BlockSpec((B, tN), lambda j: (0, j)),
        out_shape=jax.ShapeDtypeStruct((B, n_cls_pad), jnp.float32),
        compiler_params=pltpu.CompilerParams(
            dimension_semantics=("parallel",),        # shards across v7x's 2 TCs
            vmem_limit_bytes=vmem_limit),
    )(fn_pad, arc_t)

    return logits_pad[:, :n_cls], feat_pad[:, :fc_dim]


if __name__ == "__main__":
    key = jax.random.PRNGKey(0)
    k_x, k_fc, k_arc = jax.random.split(key, 3)

    # Small shapes implied by the forward pass:
    #   backbone feature map (B, num_features, H, W) = (2, 32, 8, 8)
    #   fc_dim = 16, num_classes = 24
    B, C, H, W = 2, 32, 8, 8
    fc_dim, n_cls = 16, 24

    # Backbone output in its native bf16; the kernel upcasts per tile.
    x = jax.random.normal(k_x, (B, C, H, W), dtype=jnp.float32).astype(jnp.bfloat16)
    label = jnp.zeros((B,), dtype=jnp.int32)

    # Deterministic parameter init matching _init_params():
    #   xavier_normal_(fc.weight), fc.bias = 0, bn.weight = 1, bn.bias = 0
    xavier_std = (2.0 / (C + fc_dim)) ** 0.5
    fc_w = xavier_std * jax.random.normal(k_fc, (fc_dim, C), dtype=jnp.float32)
    fc_b = jnp.zeros((fc_dim,), dtype=jnp.float32)
    arc_w = 0.02 * jax.random.normal(k_arc, (n_cls, fc_dim), dtype=jnp.float32)

    params = prepare_params(fc_w, fc_b, arc_w)       # one-time weight prep
    logits, feat = shopee_forward(x, label, params, p=3.0)
    jax.block_until_ready((logits, feat))

    assert logits.shape == (B, n_cls) and feat.shape == (B, fc_dim)
    assert bool(jnp.all(jnp.isfinite(logits))) and bool(jnp.all(jnp.isfinite(feat)))
    print("KERNEL_OK")
</pallas_src>

<mosaic_0001>
module attributes {stable_mosaic.version = 11 : i64} {
  func.func @gem_fc_kernel(%arg0: i32, %arg1: i32, %arg2: memref<2x32x64xbf16, #tpu.memory_space<vmem>>, %arg3: memref<32x128xf32, #tpu.memory_space<vmem>>, %arg4: memref<1x128xf32, #tpu.memory_space<vmem>>, %arg5: memref<2x128xf32, #tpu.memory_space<vmem>>, %arg6: memref<2x128xf32, #tpu.memory_space<vmem>>) attributes {dimension_semantics = [#tpu.dimension_semantics<parallel>, #tpu.dimension_semantics<arbitrary>], iteration_bounds = array<i64: 1, 1>, scalar_prefetch = 0 : i64, scratch_operands = 1 : i64, tpu.core_type = #tpu.core_type<tc>, window_params = [{transform_indices = @transform_0, window_bounds = array<i64: 2, 32, 64>}, {transform_indices = @transform_1, window_bounds = array<i64: 32, 128>}, {pipeline_mode = #tpu.pipeline_mode<synchronous>, transform_indices = @transform_2, window_bounds = array<i64: 1, 128>}, {transform_indices = @transform_3, window_bounds = array<i64: 2, 128>}]} {
    %c0_i32 = arith.constant 0 : i32
    %0 = arith.cmpi eq, %arg1, %c0_i32 : i32
    %1 = arith.extui %0 : i1 to i32
    %c0_i32_0 = arith.constant 0 : i32
    %2 = arith.cmpi ne, %1, %c0_i32_0 : i32
    scf.if %2 {
      %cst_15 = arith.constant 0.000000e+00 : f32
      %22 = vector.broadcast %cst_15 : f32 to vector<2x128xf32>
      %c0_16 = arith.constant 0 : index
      %c0_17 = arith.constant 0 : index
      %23 = vector.load %arg6[%c0_16, %c0_17] : memref<2x128xf32, #tpu.memory_space<vmem>>, vector<2x128xf32>
      tpu.vector_store %arg6[%c0_16, %c0_17], %22 {strides = array<i32>} : memref<2x128xf32, #tpu.memory_space<vmem>>, vector<2x128xf32>,
    } else {
    }
    %c0 = arith.constant 0 : index
    %c0_1 = arith.constant 0 : index
    %c0_2 = arith.constant 0 : index
    %3 = vector.load %arg2[%c0, %c0_1, %c0_2] : memref<2x32x64xbf16, #tpu.memory_space<vmem>>, vector<2x32x64xbf16>
    %4 = arith.extf %3 : vector<2x32x64xbf16> to vector<2x32x64xf32>
    %cst = arith.constant 9.99999997E-7 : f32
    %5 = vector.broadcast %cst : f32 to vector<2x32x64xf32>
    %6 = arith.maximumf %4, %5 : vector<2x32x64xf32>
    %7 = arith.mulf %6, %6 : vector<2x32x64xf32>
    %8 = arith.mulf %7, %6 : vector<2x32x64xf32>
    %cst_3 = arith.constant dense<0.000000e+00> : vector<2x32xf32>
    %9 = vector.multi_reduction <add>, %8, %cst_3 [2] : vector<2x32x64xf32> to vector<2x32xf32>
    %cst_4 = arith.constant 1.562500e-02 : f32
    %10 = vector.broadcast %cst_4 : f32 to vector<2x32xf32>
    %11 = arith.mulf %9, %10 : vector<2x32xf32>
    %cst_5 = arith.constant 0.333333343 : f32
    %12 = vector.broadcast %cst_5 : f32 to vector<2x32xf32>
    %13 = math.powf %11, %12 : vector<2x32xf32>
    %c0_6 = arith.constant 0 : index
    %c0_7 = arith.constant 0 : index
    %14 = vector.load %arg6[%c0_6, %c0_7] : memref<2x128xf32, #tpu.memory_space<vmem>>, vector<2x128xf32>
    %c0_8 = arith.constant 0 : index
    %c0_9 = arith.constant 0 : index
    %15 = vector.load %arg3[%c0_8, %c0_9] : memref<32x128xf32, #tpu.memory_space<vmem>>, vector<32x128xf32>
    %cst_10 = arith.constant dense<0.000000e+00> : vector<2x128xf32>
    %16 = tpu.matmul %13, %15, %cst_10 {dimension_numbers = #tpu.dot_dimension_numbers<[1], [0], [0], [1], [0, 0, 1, 1], [], []>} : vector<2x32xf32>, vector<32x128xf32>, vector<2x128xf32> -> vector<2x128xf32>
    %17 = arith.addf %14, %16 : vector<2x128xf32>
    %c0_11 = arith.constant 0 : index
    %c0_12 = arith.constant 0 : index
    %18 = vector.load %arg6[%c0_11, %c0_12] : memref<2x128xf32, #tpu.memory_space<vmem>>, vector<2x128xf32>
    tpu.vector_store %arg6[%c0_11, %c0_12], %17 {strides = array<i32>} : memref<2x128xf32, #tpu.memory_space<vmem>>, vector<2x128xf32>,
    %c0_i32_13 = arith.constant 0 : i32
    %19 = arith.cmpi eq, %arg1, %c0_i32_13 : i32
    %20 = arith.extui %19 : i1 to i32
    %c0_i32_14 = arith.constant 0 : i32
    %21 = arith.cmpi ne, %20, %c0_i32_14 : i32
    scf.if %21 {
      %c0_15 = arith.constant 0 : index
      %c0_16 = arith.constant 0 : index
      %22 = vector.load %arg6[%c0_15, %c0_16] : memref<2x128xf32, #tpu.memory_space<vmem>>, vector<2x128xf32>
      %c0_17 = arith.constant 0 : index
      %c0_18 = arith.constant 0 : index
      %23 = vector.load %arg4[%c0_17, %c0_18] : memref<1x128xf32, #tpu.memory_space<vmem>>, vector<1x128xf32>
      %24 = vector.broadcast %23 : vector<1x128xf32> to vector<2x128xf32>
      %25 = arith.addf %22, %24 : vector<2x128xf32>
      %c0_19 = arith.constant 0 : index
      %c0_20 = arith.constant 0 : index
      %26 = vector.load %arg5[%c0_19, %c0_20] : memref<2x128xf32, #tpu.memory_space<vmem>>, vector<2x128xf32>
      tpu.vector_store %arg5[%c0_19, %c0_20], %25 {strides = array<i32>} : memref<2x128xf32, #tpu.memory_space<vmem>>, vector<2x128xf32>,
    } else {
    }
    return
  }
  func.func @transform_0(%arg0: i32, %arg1: i32) -> (i32, i32, i32) {
    %c0_i32 = arith.constant 0 : i32
    %c0_i32_0 = arith.constant 0 : i32
    return %arg0, %arg1, %c0_i32 : i32, i32, i32
  }
  func.func @transform_1(%arg0: i32, %arg1: i32) -> (i32, i32) {
    %c0_i32 = arith.constant 0 : i32
    %c0_i32_0 = arith.constant 0 : i32
    return %arg1, %c0_i32 : i32, i32
  }
  func.func @transform_2(%arg0: i32, %arg1: i32) -> (i32, i32) {
    %c0_i32 = arith.constant 0 : i32
    %c0_i32_0 = arith.constant 0 : i32
    %c0_i32_1 = arith.constant 0 : i32
    return %c0_i32, %c0_i32_0 : i32, i32
  }
  func.func @transform_3(%arg0: i32, %arg1: i32) -> (i32, i32) {
    %c0_i32 = arith.constant 0 : i32
    %c0_i32_0 = arith.constant 0 : i32
    return %arg0, %c0_i32 : i32, i32
  }
}

</mosaic_0001>

<bundles_post_ra>
// kernel: tpu_custom_call.1
= control target key start
LH: loop header
LB: loop body
LE: loop exit
PB: predicated region body
PF: predicated region fallthrough
CT: control target
= control target key end

     0   :  { %8 = vsyncpa [#allocation4], 0  ;;  %s825_s0 = inlined_call_operand.hbm [shape: bf16[2,32,64], index: 0, kind: input, shape index: {}]   ;;  %s826_s1 = inlined_call_operand.hbm [shape: f32[32,128], index: 1, kind: input, shape index: {}]   ;;  %s827_s2 = inlined_call_operand.vmem [shape: f32[1,128], index: 2, kind: input, shape index: {}]   ;;  %s828_s3 = inlined_call_operand.hbm [shape: f32[2,128], index: 3, kind: output, shape index: {}]  }
   0x1   :  { %9 = vsyncpa [#allocation7], 0 }
   0x2   :  { %10 = vsyncpa [#allocation5], 0  ;;  %s582_s12 = smov [#allocation3]  }
   0x3   :  { %s16_s13 = sshll.u32 %s582_s12, 4  ;;  %s17_s13 = int_to_ptr.vmem [resolvable:$true] %s16_s13 }
   0x4   :  { %s524_s14 = scalar_lea.vmem %s17_s13, 512  ;;  %p529_p1 = scmp.lt.s32.totalorder %s17_s13, %s17_s13 }
   0x5   :  { %p525_p0 = scmp.ne.s32.totalorder %s17_s13, %s524_s14  ;;  %p530_p2 = scmp.lt.s32.totalorder %s524_s14, %s524_s14 }
   0x7   :  { %p531_p3 = por %p530_p2, %p529_p1 }
   0x9   :  { %p532_p4 = pnand %p531_p3, %p525_p0 }
   0xb   :  { %535 = shalt.err (!%p532_p4)
}
   0xc   :  { %s583_s15 = smov 64   ;;  %s584_s16 = smov 4  }
   0xd   :  { %22 = dma.hbm_to_vmem [thread:$0]  %s825_s0, 512, %s17_s13, [#allocation4], %s583_s15, %s583_s15, %s584_s16  }
   0xe   :  { %s585_s19 = smov [#allocation6]  }
   0xf   :  { %s28_s20 = sshll.u32 %s585_s19, 4  ;;  %s29_s20 = int_to_ptr.vmem [resolvable:$true] %s28_s20 }
  0x10   :  { %s544_s21 = scalar_lea.vmem %s29_s20, 512  ;;  %p549_p6 = scmp.lt.s32.totalorder %s29_s20, %s29_s20 }
  0x11   :  { %p545_p5 = scmp.ne.s32.totalorder %s29_s20, %s544_s21  ;;  %p550_p7 = scmp.lt.s32.totalorder %s544_s21, %s544_s21 }
  0x13   :  { %p551_p8 = por %p550_p7, %p549_p6 }
  0x15   :  { %p552_p9 = pnand %p551_p8, %p545_p5 }
  0x17   :  { %555 = shalt.err (!%p552_p9)
}
  0x18   :  { %s586_s22 = smov 128   ;;  %s587_s23 = smov 8  }
  0x19   :  { %34 = dma.hbm_to_vmem [thread:$0]  %s826_s1, 512, %s29_s20, [#allocation7], %s586_s22, %s586_s22, %s587_s23  }
  0x1a   :  { %576 = dma.done.wait [#allocation4], 512  }
  0x1b   :  { %577 = vsyncadd [#allocation4], 4294966784 }
  0x1c   :  { %578 = dma.done.wait [#allocation7], 512  }
  0x1d   :  { %579 = vsyncadd [#allocation7], 4294966784  ;;  %v313_v0 = vld [vmem:[#allocation3 + $0x10] sm:$0xff]   ;;  %v297_v1 = vld [vmem:[#allocation3] sm:$0xff]   ;;  %vm88_vm0 = vcmask 523264   ;;  %v588_v45 = vmov 0.0  }
  0x1e   :  { %v314_v2 = vld [vmem:[#allocation3 + $0x18] sm:$0xff]   ;;  %v306_v3 = vunpack.c.l.bf16 %v313_v0  ;;  %v298_v4 = vunpack.c.l.bf16 %v297_v1  ;;  %v307_v5 = vunpack.c.h.bf16 %v313_v0  ;;  %v299_v6 = vunpack.c.h.bf16 %v297_v1  ;;  %v312_v7 = vld [vmem:[#allocation3 + $0x8] sm:$0xff]   ;;  %320 = vmatprep.subr.mxu0 %v588_v45  ;;  %47 = vst [vmem:[#allocation2] sm:$0x3] %v588_v45  ;;  %v132_v46 = vld [vmem:[#allocation6 + $0x10] sm:$0xff]  ;;  %s590_s26 = smov [#allocation8]  }
  0x1f   :  { %v310_v8 = vunpack.c.l.bf16 %v314_v2  ;;  %v302_v9 = vunpack.c.l.bf16 %v312_v7  ;;  %v311_v10 = vunpack.c.h.bf16 %v314_v2  ;;  %v303_v14 = vunpack.c.h.bf16 %v312_v7  ;;  %v133_v44 = vld [vmem:[#allocation6 + $0x18] sm:$0xff]  ;;  %v131_v47 = vld [vmem:[#allocation6 + $0x8] sm:$0xff]  ;;  %v130_v48 = vld [vmem:[#allocation6] sm:$0xff]  ;;  %s284_s27 = sshll.u32 %s590_s26, 4  ;;  %s285_s27 = int_to_ptr.vmem [resolvable:$true] %s284_s27 }
  0x20   :  { %v68_v11 = vmax.f32 %v306_v3, 1e-06  ;;  %v64_v12 = vmax.f32 %v298_v4, 1e-06  ;;  %v69_v13 = vmax.f32 %v307_v5, 1e-06  ;;  %321 = vmatpush3.msra.mxu0 %v133_v44  ;;  %p561_p11 = scmp.lt.s32.totalorder %s285_s27, %s285_s27 }
  0x21   :  { %v65_v15 = vmax.f32 %v299_v6, 1e-06  ;;  %v70_v16 = vmax.f32 %v310_v8, 1e-06  ;;  %v66_v17 = vmax.f32 %v302_v9, 1e-06  ;;  %322 = vmatprep.subr.mxu0 %v588_v45 }
  0x22   :  { %v76_v18 = vmul.f32 %v68_v11, %v68_v11  ;;  %v72_v19 = vmul.f32 %v64_v12, %v64_v12  ;;  %v77_v20 = vmul.f32 %v69_v13, %v69_v13  ;;  %v71_v24 = vmax.f32 %v311_v10, 1e-06  ;;  %323 = vmatpush3.msra.mxu0 %v132_v46  ;;  %s556_s28 = scalar_lea.vmem %s285_s27, 32 }
  0x23   :  { %v73_v21 = vmul.f32 %v65_v15, %v65_v15  ;;  %v78_v22 = vmul.f32 %v70_v16, %v70_v16  ;;  %v74_v23 = vmul.f32 %v66_v17, %v66_v17  ;;  %v67_v28 = vmax.f32 %v303_v14, 1e-06  ;;  %324 = vmatprep.subr.mxu0 %v588_v45  ;;  %p557_p10 = scmp.ne.s32.totalorder %s285_s27, %s556_s28  ;;  %p562_p12 = scmp.lt.s32.totalorder %s556_s28, %s556_s28 }
  0x24   :  { %v84_v25 = vmul.f32 %v76_v18, %v68_v11  ;;  %v80_v26 = vmul.f32 %v72_v19, %v64_v12  ;;  %v85_v27 = vmul.f32 %v77_v20, %v69_v13  ;;  %v79_v33 = vmul.f32 %v71_v24, %v71_v24  ;;  %325 = vmatpush3.msra.mxu0 %v131_v47 }
  0x25   :  { %v81_v29 = vmul.f32 %v73_v21, %v65_v15  ;;  %v86_v32 = vmul.f32 %v78_v22, %v70_v16  ;;  %v82_v36 = vmul.f32 %v74_v23, %v66_v17  ;;  %v75_v37 = vmul.f32 %v67_v28, %v67_v28  ;;  %326 = vmatprep.subr.mxu0 %v588_v45  ;;  %p563_p13 = por %p562_p12, %p561_p11 }
  0x26   :  { %v101_v30 = vsel %vm88_vm0, %v84_v25, 0.0  ;;  %v89_v31 = vsel %vm88_vm0, %v80_v26, 0.0  ;;  %v104_v34 = vsel %vm88_vm0, %v85_v27, 0.0  ;;  %v87_v40 = vmul.f32 %v79_v33, %v71_v24  ;;  %327 = vmatpush3.msra.mxu0 %v130_v48 }
  0x27   :  { %102 = vadd.xlane.f32.xlu1 %v101_v30  ;;  %90 = vadd.xlane.f32.xlu0 %v89_v31  ;;  %v92_v35 = vsel %vm88_vm0, %v81_v29, 0.0  ;;  %v107_v38 = vsel %vm88_vm0, %v86_v32, 0.0  ;;  %v95_v39 = vsel %vm88_vm0, %v82_v36, 0.0  ;;  %v83_v41 = vmul.f32 %v75_v37, %v67_v28  ;;  %p564_p0 = pnand %p563_p13, %p557_p10 }
  0x28   :  { %v110_v42 = vsel %vm88_vm0, %v87_v40, 0.0  ;;  %vm589_vm1 = vmmov 0   ;;  %v142_v17 = vlaneseq }
  0x29   :  { %v98_v43 = vsel %vm88_vm0, %v83_v41, 0.0  ;;  %328 = vmatprep.mubr.msk.f32.mxu0 %vm589_vm1, %v588_v45 }
  0x2a   :  { %v143_v19 = vand.u32 127, %v142_v17  ;;  %v145_v23 = vshrl.u32 %v142_v17, 7 }
  0x2b   :  { %105 = vadd.xlane.f32.xlu1 %v104_v34  ;;  %93 = vadd.xlane.f32.xlu0 %v92_v35 }
  0x2c   :  { %v148_v24 = vadd.s32 4294967288, %v143_v19  ;;  %v155_v25 = vadd.s32 4294967280, %v143_v19  ;;  %v162_v26 = vadd.s32 4294967272, %v143_v19  ;;  %v673_v30 = vsub.s32 %v143_v19, %v145_v23 }
  0x2e   :  { %v675_v31 = vsub.s32 %v148_v24, %v145_v23  ;;  %v678_v35 = vsub.s32 %v155_v25, %v145_v23  ;;  %v680_v36 = vsub.s32 %v162_v26, %v145_v23 }
  0x2f   :  { %108 = vadd.xlane.f32.xlu1 %v107_v38  ;;  %96 = vadd.xlane.f32.xlu0 %v95_v39 }
  0x33   :  { %111 = vadd.xlane.f32.xlu1 %v110_v42  ;;  %99 = vadd.xlane.f32.xlu0 %v98_v43 }
  0xb0   :  { %v103_v49 = vpop.xlane.xlu1 %102  ;;  %v91_v50 = vpop.xlane.xlu0 %90 }
  0xb1   :  { %v625_v51 = vmul.f32 0.015625, %v103_v49  ;;  %v627_v52 = vmul.f32 0.015625, %v91_v50 }
  0xb3   :  { %v630_v53 = vand.u32 2147483647, %v625_v51  ;;  %v633_v54 = vand.u32 2147483647, %v627_v52  ;;  %v409_v33 = vand.u32 2147483648, %v625_v51  ;;  %v337_v37 = vand.u32 2147483648, %v627_v52 }
  0xb4   :  { %v106_v55 = vpop.xlane.xlu1 %105  ;;  %v94_v56 = vpop.xlane.xlu0 %93  ;;  %vm404_vm5 = vcmp.lt.f32.partialorder %v625_v51, 0.0  ;;  %vm332_vm7 = vcmp.lt.f32.partialorder %v627_v52, 0.0 }
  0xb5   :  { %484 = vlog2.f32 %v630_v53  ;;  %v637_v57 = vmul.f32 0.015625, %v106_v55  ;;  %v639_v58 = vmul.f32 0.015625, %v94_v56  ;;  %vm413_vm2 = vweird.f32 %v630_v53 }
  0xb6   :  { %486 = vlog2.f32 %v633_v54  ;;  %vm415_vm3 = vcmp.eq.f32.partialorder %v630_v53, 0.0  ;;  %vm341_vm4 = vweird.f32 %v633_v54  ;;  %vm343_vm6 = vcmp.eq.f32.partialorder %v633_v54, 0.0 }
  0xb7   :  { %v642_v61 = vand.u32 2147483647, %v637_v57  ;;  %v645_v62 = vand.u32 2147483647, %v639_v58  ;;  %v427_v40 = vand.u32 2147483648, %v637_v57  ;;  %v355_v43 = vand.u32 2147483648, %v639_v58 }
  0xb8   :  { %v109_v59 = vpop.xlane.xlu1 %108  ;;  %v97_v60 = vpop.xlane.xlu0 %96  ;;  %vm422_vm9 = vcmp.lt.f32.partialorder %v637_v57, 0.0  ;;  %vm350_vm11 = vcmp.lt.f32.partialorder %v639_v58, 0.0  ;;  %vm829_vm13 = vcmp.eq.f32.partialorder %v637_v57, 0.0 }
  0xb9   :  { %488 = vlog2.f32 %v642_v61  ;;  %v649_v0 = vmul.f32 0.015625, %v109_v59  ;;  %v651_v1 = vmul.f32 0.015625, %v97_v60  ;;  %vm431_vm10 = vweird.f32 %v642_v61 }
  0xba   :  { %490 = vlog2.f32 %v645_v62  ;;  %vm433_vm12 = vcmp.eq.f32.partialorder %v642_v61, 0.0  ;;  %vm359_vm14 = vweird.f32 %v645_v62  ;;  %vm361_vm15 = vcmp.eq.f32.partialorder %v645_v62, 0.0 }
  0xbb   :  { %v654_v3 = vand.u32 2147483647, %v649_v0  ;;  %v659_v5 = vand.u32 2147483647, %v651_v1  ;;  %v445_v49 = vand.u32 2147483648, %v649_v0  ;;  %vm424_vm0 = vcmp.eq.f32.partialorder %v642_v61, inf }
  0xbc   :  { %v112_v63 = vpop.xlane.xlu1 %111  ;;  %v100_v2 = vpop.xlane.xlu0 %99  ;;  %vm368_vm8 = vcmp.lt.f32.partialorder %v651_v1, 0.0  ;;  %v373_v60 = vand.u32 2147483648, %v651_v1 }
  0xbd   :  { %v656_v4 = vmul.f32 0.015625, %v112_v63  ;;  %v661_v6 = vmul.f32 0.015625, %v100_v2  ;;  %492 = vlog2.f32 %v654_v3  ;;  %vm449_vm1 = vweird.f32 %v654_v3 }
  0xbe   :  { %494 = vlog2.f32 %v659_v5 }
  0xbf   :  { %v666_v10 = vand.u32 2147483647, %v656_v4  ;;  %v669_v12 = vand.u32 2147483647, %v661_v6 }
  0xc2   :  { %v485_v7 = vpop.eup %484 }
  0xc3   :  { %v487_v8 = vpop.eup %486  ;;  %v410_v9 = vmul.f32 0.33333334, %v485_v7 }
  0xc4   :  { %v338_v11 = vmul.f32 0.33333334, %v487_v8 }
  0xc5   :  { %496 = vpow2.f32 %v410_v9 }
  0xc6   :  { %498 = vpow2.f32 %v338_v11  ;;  %v489_v13 = vpop.eup %488 }
  0xc7   :  { %500 = vlog2.f32 %v666_v10  ;;  %v491_v14 = vpop.eup %490  ;;  %v428_v15 = vmul.f32 0.33333334, %v489_v13  ;;  %v463_v13 = vand.u32 2147483648, %v656_v4 }
  0xc8   :  { %502 = vlog2.f32 %v669_v12  ;;  %v356_v16 = vmul.f32 0.33333334, %v491_v14 }
  0xc9   :  { %504 = vpow2.f32 %v428_v15 }
  0xca   :  { %506 = vpow2.f32 %v356_v16  ;;  %v493_v18 = vpop.eup %492  ;;  %v391_v16 = vand.u32 2147483648, %v661_v6 }
  0xcb   :  { %v495_v20 = vpop.eup %494  ;;  %v446_v21 = vmul.f32 0.33333334, %v493_v18 }
  0xcc   :  { %v374_v22 = vmul.f32 0.33333334, %v495_v20 }
  0xcd   :  { %508 = vpow2.f32 %v446_v21 }
  0xce   :  { %510 = vpow2.f32 %v374_v22 }
  0xd2   :  { %v497_v27 = vpop.eup %496 }
  0xd3   :  { %v499_v28 = vpop.eup %498  ;;  %v412_v39 = vor.u32 %v497_v27, %v409_v33 }
  0xd4   :  { %v501_v29 = vpop.eup %500  ;;  %v340_v42 = vor.u32 %v499_v28, %v337_v37 }
  0xd5   :  { %v503_v32 = vpop.eup %502  ;;  %v464_v34 = vmul.f32 0.33333334, %v501_v29  ;;  %v414_v47 = vsel %vm413_vm2, %v625_v51, %v412_v39  ;;  %vm367_vm2 = vcmp.eq.f32.partialorder %v651_v1, 0.0 }
  0xd6   :  { %v392_v38 = vmul.f32 0.33333334, %v503_v32  ;;  %v505_v41 = vpop.eup %504  ;;  %v342_v50 = vsel %vm341_vm4, %v627_v52, %v340_v42  ;;  %v417_v2 = vsel %vm415_vm3, %v409_v33, %v414_v47  ;;  %vm451_vm4 = vcmp.eq.f32.partialorder %v654_v3, 0.0 }
  0xd7   :  { %512 = vpow2.f32 %v464_v34  ;;  %v507_v44 = vpop.eup %506  ;;  %v430_v45 = vor.u32 %v505_v41, %v427_v40  ;;  %v345_v8 = vsel %vm343_vm6, %v337_v37, %v342_v50  ;;  %v418_v17 = vsel %vm404_vm5, nan, %v417_v2 }
  0xd8   :  { %514 = vpow2.f32 %v392_v38  ;;  %v358_v46 = vor.u32 %v507_v44, %v355_v43  ;;  %v346_v19 = vsel %vm332_vm7, nan, %v345_v8  ;;  %vm385_vm5 = vcmp.eq.f32.partialorder %v661_v6, 0.0 }
  0xd9   :  { %v432_v48 = vsel %vm431_vm10, %v637_v57, %v430_v45  ;;  %vm352_vm10 = vcmp.eq.f32.partialorder %v645_v62, inf  ;;  %vm830_vm6 = vcmp.eq.f32.partialorder %v639_v58, 0.0  ;;  %vm831_vm3 = vcmp.lt.f32.partialorder %v649_v0, 0.0 }
  0xda   :  { %v435_v55 = vsel %vm433_vm12, %v427_v40, %v432_v48  ;;  %v360_v56 = vsel %vm359_vm14, %v639_v58, %v358_v46  ;;  %v509_v63 = vpop.eup %508  ;;  %vm377_vm12 = vweird.f32 %v659_v5  ;;  %vm379_vm14 = vcmp.eq.f32.partialorder %v659_v5, 0.0 }
  0xdb   :  { %v363_v59 = vsel %vm361_vm15, %v355_v43, %v360_v56  ;;  %v511_v7 = vpop.eup %510  ;;  %v436_v9 = vsel %vm422_vm9, nan, %v435_v55  ;;  %v448_v11 = vor.u32 %v509_v63, %v445_v49  ;;  %vm386_vm9 = vcmp.lt.f32.partialorder %v661_v6, 0.0  ;;  %v129_v55 = vld [vmem:[#allocation2] sm:$0x3] }
  0xdc   :  { %v364_v14 = vsel %vm350_vm11, nan, %v363_v59  ;;  %v376_v15 = vor.u32 %v511_v7, %v373_v60  ;;  %vm370_vm11 = vcmp.eq.f32.partialorder %v659_v5, inf  ;;  %vm442_vm15 = vcmp.eq.f32.partialorder %v654_v3, inf }
  0xdd   :  { %v450_v18 = vsel %vm449_vm1, %v649_v0, %v448_v11  ;;  %v437_v20 = vsel %vm829_vm13, 0.0, %v436_v9  ;;  %vm160_vm1 = vcmask 195712   ;;  %v365_v23 = vsel %vm830_vm6, 0.0, %v364_v14 }
  0xde   :  { %v453_v21 = vsel %vm451_vm4, %v445_v49, %v450_v18  ;;  %v378_v22 = vsel %vm377_vm12, %v651_v1, %v376_v15  ;;  %vm395_vm7 = vweird.f32 %v669_v12  ;;  %vm167_vm13 = vcmask 261312  }
  0xdf   :  { %v454_v24 = vsel %vm831_vm3, nan, %v453_v21  ;;  %v381_v57 = vsel %vm379_vm14, %v373_v60, %v378_v22  ;;  %vm832_vm4 = vcmp.eq.f32.partialorder %v625_v51, 0.0  ;;  %vm833_vm12 = vcmp.eq.f32.partialorder %v649_v0, 0.0 }
  0xe0   :  { %v419_v26 = vsel %vm832_vm4, 0.0, %v418_v17  ;;  %v455_v27 = vsel %vm833_vm12, 0.0, %v454_v24  ;;  %v382_v58 = vsel %vm368_vm8, nan, %v381_v57  ;;  %vm397_vm6 = vcmp.eq.f32.partialorder %v669_v12, 0.0 }
  0xe1   :  { %vm834_vm3 = vcmp.eq.f32.partialorder %v627_v52, 0.0  ;;  %v438_v32 = vsel %vm424_vm0, inf, %v437_v20  ;;  %v383_v33 = vsel %vm367_vm2, 0.0, %v382_v58  ;;  %v366_v0 = vsel %vm352_vm10, inf, %v365_v23 }
  0xe2   :  { %v347_v29 = vsel %vm834_vm3, 0.0, %v346_v19  ;;  %v456_v37 = vsel %vm442_vm15, inf, %v455_v27  ;;  %vm460_vm8 = vcmp.eq.f32.partialorder %v666_v10, inf  ;;  %vm835_vm14 = vcmp.eq.f32.partialorder %v630_v53, inf }
  0xe3   :  { %v420_v52 = vsel %vm835_vm14, inf, %v419_v26  ;;  %vm836_vm4 = vweird.f32 %v666_v10  ;;  %v384_v1 = vsel %vm370_vm11, inf, %v383_v33  ;;  %vm469_vm0 = vcmp.eq.f32.partialorder %v666_v10, 0.0 }
  0xe4   :  { %v513_v25 = vpop.eup %512  ;;  %vm837_vm2 = vcmp.eq.f32.partialorder %v633_v54, inf  ;;  %v176_v53 = vrot.slane %v438_v32, %v675_v31  ;;  %vm838_vm10 = vcmp.lt.f32.partialorder %v656_v4, 0.0  ;;  %v152_v5 = vrot.slane %v366_v0, %v675_v31 }
  0xe5   :  { %v515_v28 = vpop.eup %514  ;;  %v466_v51 = vor.u32 %v513_v25, %v463_v13  ;;  %v348_v62 = vsel %vm837_vm2, inf, %v347_v29  ;;  %v181_v41 = vrot.slane %v456_v37, %v678_v35  ;;  %vm839_vm15 = vcmp.eq.f32.partialorder %v656_v4, 0.0 }
  0xe6   :  { %v394_v34 = vor.u32 %v515_v28, %v391_v16  ;;  %v159_v43 = vrot.slane %v384_v1, %v678_v35  ;;  %v172_v44 = vrot.slane %v420_v52, %v673_v30  ;;  %vm388_vm11 = vcmp.eq.f32.partialorder %v669_v12, inf }
  0xe7   :  { %v468_v61 = vsel %vm836_vm4, %v656_v4, %v466_v51  ;;  %v147_v46 = vrot.slane %v348_v62, %v673_v30  ;;  %vm188_vm12 = vcmask 1041409  }
  0xe8   :  { %v396_v3 = vsel %vm395_vm7, %v661_v6, %v394_v34  ;;  %v471_v38 = vsel %vm469_vm0, %v463_v13, %v468_v61  ;;  %vm840_vm7 = vcmask 130112  }
  0xe9   :  { %v399_v39 = vsel %vm397_vm6, %v391_v16, %v396_v3  ;;  %v472_v40 = vsel %vm838_vm10, nan, %v471_v38  ;;  %v177_v48 = vsel %vm840_vm7, %v176_v53, %v172_v44 }
  0xea   :  { %v400_v54 = vsel %vm386_vm9, nan, %v399_v39  ;;  %v473_v42 = vsel %vm839_vm15, 0.0, %v472_v40  ;;  %vm841_vm9 = vmmov %vm840_vm7  ;;  %v182_v50 = vsel %vm160_vm1, %v181_v41, %v177_v48 }
  0xeb   :  { %v401_v45 = vsel %vm385_vm5, 0.0, %v400_v54  ;;  %v474_v31 = vsel %vm460_vm8, inf, %v473_v42  ;;  %v154_v49 = vsel %vm841_vm9, %v152_v5, %v147_v46  ;;  %vm190_vm5 = vcmask 261120  }
  0xec   :  { %v402_v47 = vsel %vm388_vm11, inf, %v401_v45  ;;  %v186_v4 = vrot.slane %v474_v31, %v680_v36  ;;  %v161_v6 = vsel %vm160_vm1, %v159_v43, %v154_v49 }
  0xed   :  { %v166_v35 = vrot.slane %v402_v47, %v680_v36  ;;  %v295_v36 = vld [vmem:[%s827_s2] ss:$0 sm:$0xff] }
  0xee   :  { %v187_v12 = vsel %vm167_vm13, %v186_v4, %v182_v50 }
  0xef   :  { %v168_v10 = vsel %vm167_vm13, %v166_v35, %v161_v6 }
  0xf0   :  { %v189_v30 = vsel %vm188_vm12, %v187_v12, %v168_v10 }
  0xf1   :  { %329 = vmatmul.mubr.msk.f32.vlgmr.msra.gmra.mxu0 %vm190_vm5, %v189_v30 }
 0x1b1   :  { %v259_v56 = vpop.f32.mrf.mxu0 }
 0x1b2   :  { %v263_v59 = vadd.f32 %v259_v56, %v129_v55 }
 0x1b3   :  { %v330_v60 = vpop.f32.mrf.mxu0 }
 0x1b4   :  { %264 = vst [vmem:[#allocation2] sm:$0x3] %v263_v59 }
 0x1bb   :  { %v268_v63 = vld [vmem:[#allocation2] sm:$0x3] }
 0x1bc   :  { %v276_v2 = vadd.f32 %v295_v36, %v268_v63 }
 0x1be   :  { %277 = vst [vmem:[#allocation8] sm:$0x3] %v276_v2 }
 0x1bf   :  { %567 = shalt.err (!%p564_p0)
}
 0x1c0   :  { %287 = dma.vmem_to_hbm [thread:$0]  %s285_s27, 32, %s828_s3, [#allocation5]  }
 0x1c1   :  { %580 = dma.done.wait [#allocation5], 32  }
 0x1c2   :  { %581 = vsyncadd [#allocation5], 4294967264 }
 0x1c3   :  { %291 = vsyncpa [#allocation4], 1 }
 0x1c4   :  { %292 = vsyncpa [#allocation7], 1 }
 0x1c5   :  { %293 = vsyncpa [#allocation5], 1 }

</bundles_post_ra>
